<compile_context>
chip_gen: v6e
topology: v6e:2x2x1
jax: 0.10.0
libtpu: 0.0.40
codegen_flags: <defaults>
</compile_context>

<pallas_src>
import functools
import math

import jax
import jax.numpy as jnp
import numpy as np
from jax.experimental import pallas as pl
from jax.experimental.pallas import tpu as pltpu


def _layer_norm(t, g, b, eps):
    mu = jnp.mean(t, axis=-1, keepdims=True)
    var = jnp.mean(jnp.square(t - mu), axis=-1, keepdims=True)
    return (t - mu) * jax.lax.rsqrt(var + eps) * g + b


def encoder_layer_kernel(x_ref,
                         w_qkv_ref, b_qkv_ref,
                         wo_ref, bo_ref, g1_ref, be1_ref,
                         w1_ref, b1_ref, w2_ref, b2_ref, g2_ref, be2_ref,
                         mask_k_ref, mask_v_ref,
                         o_ref, *, n_head, d_k, d_v, eps):
    bb, s_len, d_model = x_ref.shape
    tokens = bb * s_len
    dq = n_head * d_k            # concatenated query/key width
    cdt = jnp.bfloat16           # MXU operand dtype (accumulate in f32)
    scale = 1.0 / math.sqrt(d_k)

    x = x_ref[...].reshape(tokens, d_model).astype(jnp.float32)   # (T, D)
    x_c = x.astype(cdt)

    # --- fused Q/K/V projection: one (T, D) x (D, 3*H*d_k) matmul ---
    qkv = jnp.dot(x_c, w_qkv_ref[...],
                  preferred_element_type=jnp.float32) + b_qkv_ref[...]
    q = qkv[:, :dq]              # (T, H*d_k)  static 32-aligned lane slices
    k = qkv[:, dq:2 * dq]        # (T, H*d_k)
    v = qkv[:, 2 * dq:]          # (T, H*d_v)

    # Head-indicator masks: precomputed wrapper-side, resident bf16 0/1 arrays.
    #   row j = h*S + t  <->  key/value t of head h
    mask_k = mask_k_ref[...]     # (H*S, H*d_k) bf16
    mask_v = mask_v_ref[...]     # (H*S, H*d_v) bf16

    def attend(qb, kb, vb):
        # qb/kb: (S, H*d_k) f32, vb: (S, H*d_v) f32  ->  (S, H*d_v) f32
        k_rows = jnp.tile(kb.astype(cdt), (n_head, 1)) * mask_k   # (H*S, H*d_k)
        v_rows = jnp.tile(vb.astype(cdt), (n_head, 1)) * mask_v   # (H*S, H*d_v)
        # Scores for ALL heads in one matmul; column j = h*S + t.
        s_all = jnp.einsum('qc,jc->qj', qb.astype(cdt), k_rows,
                           preferred_element_type=jnp.float32) * scale   # (S, H*S)
        # Softmax is shift-invariant per head group -> a global row max works.
        # TODO(synk): switch to a per-head (segmented) max if head score ranges
        # can differ by >~80 (f32 exp underflow); the denom clamp below only
        # prevents inf/NaN, it does not recover the underflowed head.
        s_all = s_all - jnp.max(s_all, axis=-1, keepdims=True)
        p = jnp.exp(s_all)                                                # f32
        p_c = p.astype(cdt)
        # Un-normalized context, already in concatenated (S, H*d_v) head order.
        ctx_un = jnp.dot(p_c, v_rows, preferred_element_type=jnp.float32)
        # Per-(row, head) softmax denominator from the SAME rounded p, broadcast
        # over that head's d_v columns (bf16 x bf16 -> fast MXU path).
        denom = jnp.dot(p_c, mask_v, preferred_element_type=jnp.float32)
        denom = jnp.maximum(denom, 1e-20)
        return ctx_un * pl.reciprocal(denom, approx=True)

    if bb == 1:
        ctx = attend(q, k, v)
    else:
        # Static (small) unroll over batch elements of this block; aligned
        # sublane row-slices only (no lane-offset slicing, no per-head loop).
        ctx = jnp.concatenate(
            [attend(q[b * s_len:(b + 1) * s_len],
                    k[b * s_len:(b + 1) * s_len],
                    v[b * s_len:(b + 1) * s_len]) for b in range(bb)],
            axis=0)

    # --- output projection + residual + LayerNorm (f32 statistics) ---
    attn = jnp.dot(ctx.astype(cdt), wo_ref[...],
                   preferred_element_type=jnp.float32) + bo_ref[...]
    y = _layer_norm(attn + x, g1_ref[...], be1_ref[...], eps)

    # --- position-wise FFN (Conv1d k=1 == per-token linear) + residual + LN ---
    h1 = jnp.dot(y.astype(cdt), w1_ref[...],
                 preferred_element_type=jnp.float32) + b1_ref[...]
    h1 = jnp.maximum(h1, 0.0)
    ff = jnp.dot(h1.astype(cdt), w2_ref[...],
                 preferred_element_type=jnp.float32) + b2_ref[...]
    z = _layer_norm(ff + y, g2_ref[...], be2_ref[...], eps)

    o_ref[...] = z.reshape(bb, s_len, d_model).astype(o_ref.dtype)


def _num_tensorcores():
    """Best-effort TC-per-chip query; falls back to 1 (never split)."""
    try:
        info = pltpu.get_tpu_info()
    except Exception:
        return 1
    for name in ("num_cores", "num_tensorcores", "cores_per_chip",
                 "tensorcores_per_chip"):
        val = getattr(info, name, None)
        if isinstance(val, int) and val > 0:
            return val
    return 1


def _pick_block_b(batch, seq, d_model):
    """Batch elements per grid step.

    Default is ONE grid step (bb = batch): on 1-TC chips (v5e/v6e) the grid is a
    serial loop and each extra step costs ~0.35us of pure overhead.  Split the
    batch only when the chip has >= 2 TensorCores (v7x) AND each half carries
    enough work to clearly exceed the per-step overhead.
    """
    if batch < 2:
        return max(1, batch)
    if _num_tensorcores() < 2:
        return batch
    if batch * seq * d_model < (1 << 18):     # tiny problem: overhead-bound
        return batch
    bb = batch // 2
    while batch % bb:
        bb -= 1
    return max(1, bb)


def encoder_layer(x, params, *, n_head, d_k, d_v, eps=1e-6):
    B, S, D = x.shape
    bb = _pick_block_b(B, S, D)
    num_blocks = B // bb

    (wq, bq, wk, bk, wv, bv, wo, bo, g1, be1, w1, b1, w2, b2, g2, be2) = params
    bf16 = jnp.bfloat16

    # Fuse QKV weights/biases once wrapper-side; cast matmul weights to bf16
    # (MXU high-rate path, halves weight DMA).  Biases / LN params stay f32.
    w_qkv = jnp.concatenate([wq, wk, wv], axis=1).astype(bf16)   # (D, 3*H*d_k)
    b_qkv = jnp.concatenate([bq, bk, bv], axis=1)                # (1, 3*H*d_k) f32

    # Head-indicator masks (loop-invariant): precompute once, pass as residents.
    hs, dq, dvt = n_head * S, n_head * d_k, n_head * d_v
    rows = np.arange(hs)[:, None] // S
    mask_k = jnp.asarray(rows == (np.arange(dq)[None, :] // d_k), dtype=bf16)
    mask_v = jnp.asarray(rows == (np.arange(dvt)[None, :] // d_v), dtype=bf16)

    params_dev = (w_qkv, b_qkv,
                  wo.astype(bf16), bo, g1, be1,
                  w1.astype(bf16), b1, w2.astype(bf16), b2, g2, be2,
                  mask_k, mask_v)

    def full_spec(a):
        # Weights/biases/masks: full-array blocks, resident across all grid steps.
        nd = a.ndim
        return pl.BlockSpec(a.shape, lambda b_, nd=nd: (0,) * nd)

    in_specs = [pl.BlockSpec((bb, S, D), lambda b_: (b_, 0, 0))]
    in_specs += [full_spec(p) for p in params_dev]
    out_spec = pl.BlockSpec((bb, S, D), lambda b_: (b_, 0, 0))

    kernel = functools.partial(encoder_layer_kernel,
                               n_head=n_head, d_k=d_k, d_v=d_v, eps=eps)

    return pl.pallas_call(
        kernel,
        out_shape=jax.ShapeDtypeStruct((B, S, D), x.dtype),
        grid_spec=pltpu.PrefetchScalarGridSpec(
            num_scalar_prefetch=0,
            grid=(num_blocks,),
            in_specs=in_specs,
            out_specs=out_spec,
        ),
        compiler_params=pltpu.CompilerParams(
            dimension_semantics=("parallel",),
            # Explicit budget: safe on v5e/v6e (128 MiB) and within v7x's 64 MiB.
            vmem_limit_bytes=32 * 1024 * 1024,
        ),
    )(x, *params_dev)


def reference_encoder_layer(x, params, *, n_head, d_k, d_v, eps=1e-6):
    (wq, bq, wk, bk, wv, bv, wo, bo, g1, be1, w1, b1, w2, b2, g2, be2) = params

    def ln(t, g, b):
        mu = jnp.mean(t, axis=-1, keepdims=True)
        var = jnp.mean((t - mu) ** 2, axis=-1, keepdims=True)
        return (t - mu) * jax.lax.rsqrt(var + eps) * g + b

    B, S, D = x.shape
    q = x @ wq + bq
    k = x @ wk + bk
    v = x @ wv + bv
    q = q.reshape(B, S, n_head, d_k).transpose(0, 2, 1, 3)
    k = k.reshape(B, S, n_head, d_k).transpose(0, 2, 1, 3)
    v = v.reshape(B, S, n_head, d_v).transpose(0, 2, 1, 3)
    s = jnp.einsum('bhqd,bhkd->bhqk', q, k) / math.sqrt(d_k)
    p = jax.nn.softmax(s, axis=-1)
    ctx = jnp.einsum('bhqk,bhkd->bhqd', p, v).transpose(0, 2, 1, 3).reshape(B, S, n_head * d_v)
    y = ln(ctx @ wo + bo + x, g1, be1)
    ff = jnp.maximum(y @ w1 + b1, 0.0) @ w2 + b2
    return ln(ff + y, g2, be2)


if __name__ == "__main__":
    # Small shapes consistent with the module.
    B, S = 2, 8
    dim_model, dim_inner = 32, 64
    n_head, d_k, d_v = 4, 8, 8

    key = jax.random.PRNGKey(0)
    ks = jax.random.split(key, 10)
    init = lambda k, shape: (0.02 * jax.random.normal(k, shape)).astype(jnp.float32)

    x = jax.random.normal(ks[0], (B, S, dim_model), dtype=jnp.float32)

    wq = init(ks[1], (dim_model, n_head * d_k)); bq = jnp.zeros((1, n_head * d_k), jnp.float32)
    wk = init(ks[2], (dim_model, n_head * d_k)); bk = jnp.zeros((1, n_head * d_k), jnp.float32)
    wv = init(ks[3], (dim_model, n_head * d_v)); bv = jnp.zeros((1, n_head * d_v), jnp.float32)
    wo = init(ks[4], (n_head * d_v, dim_model)); bo = jnp.zeros((1, dim_model), jnp.float32)
    g1 = jnp.ones((1, dim_model), jnp.float32);  be1 = jnp.zeros((1, dim_model), jnp.float32)
    w1 = init(ks[5], (dim_model, dim_inner));    b1 = jnp.zeros((1, dim_inner), jnp.float32)
    w2 = init(ks[6], (dim_inner, dim_model));    b2 = jnp.zeros((1, dim_model), jnp.float32)
    g2 = jnp.ones((1, dim_model), jnp.float32);  be2 = jnp.zeros((1, dim_model), jnp.float32)

    params = (wq, bq, wk, bk, wv, bv, wo, bo, g1, be1, w1, b1, w2, b2, g2, be2)

    out = encoder_layer(x, params, n_head=n_head, d_k=d_k, d_v=d_v)
    out = jax.block_until_ready(out)

    ref = reference_encoder_layer(x, params, n_head=n_head, d_k=d_k, d_v=d_v)
    # bf16 MXU operands (f32 accumulation) => compare with a bf16-appropriate tolerance.
    np.testing.assert_allclose(np.asarray(out), np.asarray(ref), rtol=2e-2, atol=2e-2)

    print("KERNEL_OK")
</pallas_src>

<mosaic_0001>
module attributes {stable_mosaic.version = 11 : i64} {
  func.func @encoder_layer_kernel(%arg0: i32, %arg1: memref<2x8x32xf32, #tpu.memory_space<vmem>>, %arg2: memref<32x96xbf16, #tpu.memory_space<vmem>>, %arg3: memref<1x96xf32, #tpu.memory_space<vmem>>, %arg4: memref<32x32xbf16, #tpu.memory_space<vmem>>, %arg5: memref<1x32xf32, #tpu.memory_space<vmem>>, %arg6: memref<1x32xf32, #tpu.memory_space<vmem>>, %arg7: memref<1x32xf32, #tpu.memory_space<vmem>>, %arg8: memref<32x64xbf16, #tpu.memory_space<vmem>>, %arg9: memref<1x64xf32, #tpu.memory_space<vmem>>, %arg10: memref<64x32xbf16, #tpu.memory_space<vmem>>, %arg11: memref<1x32xf32, #tpu.memory_space<vmem>>, %arg12: memref<1x32xf32, #tpu.memory_space<vmem>>, %arg13: memref<1x32xf32, #tpu.memory_space<vmem>>, %arg14: memref<32x32xbf16, #tpu.memory_space<vmem>>, %arg15: memref<32x32xbf16, #tpu.memory_space<vmem>>, %arg16: memref<2x8x32xf32, #tpu.memory_space<vmem>>) attributes {dimension_semantics = [#tpu.dimension_semantics<parallel>], iteration_bounds = array<i64: 1>, scalar_prefetch = 0 : i64, scratch_operands = 0 : i64, tpu.core_type = #tpu.core_type<tc>, window_params = [{transform_indices = @transform_0, window_bounds = array<i64: 2, 8, 32>}, {pipeline_mode = #tpu.pipeline_mode<synchronous>, transform_indices = @transform_1, window_bounds = array<i64: 32, 96>}, {pipeline_mode = #tpu.pipeline_mode<synchronous>, transform_indices = @transform_2, window_bounds = array<i64: 1, 96>}, {pipeline_mode = #tpu.pipeline_mode<synchronous>, transform_indices = @transform_3, window_bounds = array<i64: 32, 32>}, {pipeline_mode = #tpu.pipeline_mode<synchronous>, transform_indices = @transform_4, window_bounds = array<i64: 1, 32>}, {pipeline_mode = #tpu.pipeline_mode<synchronous>, transform_indices = @transform_5, window_bounds = array<i64: 1, 32>}, {pipeline_mode = #tpu.pipeline_mode<synchronous>, transform_indices = @transform_6, window_bounds = array<i64: 1, 32>}, {pipeline_mode = #tpu.pipeline_mode<synchronous>, transform_indices = @transform_7, window_bounds = array<i64: 32, 64>}, {pipeline_mode = #tpu.pipeline_mode<synchronous>, transform_indices = @transform_8, window_bounds = array<i64: 1, 64>}, {pipeline_mode = #tpu.pipeline_mode<synchronous>, transform_indices = @transform_9, window_bounds = array<i64: 64, 32>}, {pipeline_mode = #tpu.pipeline_mode<synchronous>, transform_indices = @transform_10, window_bounds = array<i64: 1, 32>}, {pipeline_mode = #tpu.pipeline_mode<synchronous>, transform_indices = @transform_11, window_bounds = array<i64: 1, 32>}, {pipeline_mode = #tpu.pipeline_mode<synchronous>, transform_indices = @transform_12, window_bounds = array<i64: 1, 32>}, {pipeline_mode = #tpu.pipeline_mode<synchronous>, transform_indices = @transform_13, window_bounds = array<i64: 32, 32>}, {pipeline_mode = #tpu.pipeline_mode<synchronous>, transform_indices = @transform_14, window_bounds = array<i64: 32, 32>}, {transform_indices = @transform_15, window_bounds = array<i64: 2, 8, 32>}]} {
    %c0 = arith.constant 0 : index
    %c0_0 = arith.constant 0 : index
    %c0_1 = arith.constant 0 : index
    %0 = vector.load %arg1[%c0, %c0_0, %c0_1] : memref<2x8x32xf32, #tpu.memory_space<vmem>>, vector<2x8x32xf32>
    %1 = vector.shape_cast %0 : vector<2x8x32xf32> to vector<16x32xf32>
    %2 = arith.truncf %1 : vector<16x32xf32> to vector<16x32xbf16>
    %c0_2 = arith.constant 0 : index
    %c0_3 = arith.constant 0 : index
    %3 = vector.load %arg2[%c0_2, %c0_3] : memref<32x96xbf16, #tpu.memory_space<vmem>>, vector<32x96xbf16>
    %cst = arith.constant dense<0.000000e+00> : vector<16x96xf32>
    %4 = tpu.matmul %2, %3, %cst {dimension_numbers = #tpu.dot_dimension_numbers<[1], [0], [0], [1], [0, 0, 1, 1], [], []>} : vector<16x32xbf16>, vector<32x96xbf16>, vector<16x96xf32> -> vector<16x96xf32>
    %c0_4 = arith.constant 0 : index
    %c0_5 = arith.constant 0 : index
    %5 = vector.load %arg3[%c0_4, %c0_5] : memref<1x96xf32, #tpu.memory_space<vmem>>, vector<1x96xf32>
    %6 = vector.broadcast %5 : vector<1x96xf32> to vector<16x96xf32>
    %7 = arith.addf %4, %6 : vector<16x96xf32>
    %8 = vector.extract_strided_slice %7 {offsets = [0, 0], sizes = [16, 32], strides = [1, 1]} : vector<16x96xf32> to vector<16x32xf32>
    %9 = vector.extract_strided_slice %7 {offsets = [0, 32], sizes = [16, 32], strides = [1, 1]} : vector<16x96xf32> to vector<16x32xf32>
    %10 = vector.extract_strided_slice %7 {offsets = [0, 64], sizes = [16, 32], strides = [1, 1]} : vector<16x96xf32> to vector<16x32xf32>
    %c0_6 = arith.constant 0 : index
    %c0_7 = arith.constant 0 : index
    %11 = vector.load %arg14[%c0_6, %c0_7] : memref<32x32xbf16, #tpu.memory_space<vmem>>, vector<32x32xbf16>
    %c0_8 = arith.constant 0 : index
    %c0_9 = arith.constant 0 : index
    %12 = vector.load %arg15[%c0_8, %c0_9] : memref<32x32xbf16, #tpu.memory_space<vmem>>, vector<32x32xbf16>
    %13 = vector.extract_strided_slice %8 {offsets = [0, 0], sizes = [8, 32], strides = [1, 1]} : vector<16x32xf32> to vector<8x32xf32>
    %14 = vector.extract_strided_slice %9 {offsets = [0, 0], sizes = [8, 32], strides = [1, 1]} : vector<16x32xf32> to vector<8x32xf32>
    %15 = vector.extract_strided_slice %10 {offsets = [0, 0], sizes = [8, 32], strides = [1, 1]} : vector<16x32xf32> to vector<8x32xf32>
    %16 = arith.truncf %14 : vector<8x32xf32> to vector<8x32xbf16>
    %17 = tpu.concatenate %16, %16, %16, %16 in 0 : vector<8x32xbf16>, vector<8x32xbf16>, vector<8x32xbf16>, vector<8x32xbf16> -> vector<32x32xbf16>
    %18 = arith.mulf %17, %11 : vector<32x32xbf16>
    %19 = arith.truncf %15 : vector<8x32xf32> to vector<8x32xbf16>
    %20 = tpu.concatenate %19, %19, %19, %19 in 0 : vector<8x32xbf16>, vector<8x32xbf16>, vector<8x32xbf16>, vector<8x32xbf16> -> vector<32x32xbf16>
    %21 = arith.mulf %20, %12 : vector<32x32xbf16>
    %22 = arith.truncf %13 : vector<8x32xf32> to vector<8x32xbf16>
    "tpu.trace_start"() <{level = 10 : i32, message = "qc,jc->qj"}> : () -> ()
    %cst_10 = arith.constant dense<0.000000e+00> : vector<8x32xf32>
    %23 = tpu.matmul %22, %18, %cst_10 {dimension_numbers = #tpu.dot_dimension_numbers<[1], [1], [0], [0], [0, 0, 1, 0], [], []>} : vector<8x32xbf16>, vector<32x32xbf16>, vector<8x32xf32> -> vector<8x32xf32>
    "tpu.trace_stop"() : () -> ()
    %cst_11 = arith.constant 0.353553385 : f32
    %24 = vector.broadcast %cst_11 : f32 to vector<8x32xf32>
    %25 = arith.mulf %23, %24 : vector<8x32xf32>
    %cst_12 = arith.constant dense<0xFF800000> : vector<8xf32>
    %26 = vector.multi_reduction <maximumf>, %25, %cst_12 [1] : vector<8x32xf32> to vector<8xf32>
    %27 = vector.shape_cast %26 : vector<8xf32> to vector<8x1xf32>
    %28 = vector.broadcast %27 : vector<8x1xf32> to vector<8x32xf32>
    %29 = arith.subf %25, %28 : vector<8x32xf32>
    %30 = math.exp %29 : vector<8x32xf32>
    %31 = arith.truncf %30 : vector<8x32xf32> to vector<8x32xbf16>
    %cst_13 = arith.constant dense<0.000000e+00> : vector<8x32xf32>
    %32 = tpu.matmul %31, %21, %cst_13 {dimension_numbers = #tpu.dot_dimension_numbers<[1], [0], [0], [1], [0, 0, 1, 1], [], []>} : vector<8x32xbf16>, vector<32x32xbf16>, vector<8x32xf32> -> vector<8x32xf32>
    %cst_14 = arith.constant dense<0.000000e+00> : vector<8x32xf32>
    %33 = tpu.matmul %31, %12, %cst_14 {dimension_numbers = #tpu.dot_dimension_numbers<[1], [0], [0], [1], [0, 0, 1, 1], [], []>} : vector<8x32xbf16>, vector<32x32xbf16>, vector<8x32xf32> -> vector<8x32xf32>
    %cst_15 = arith.constant 9.99999968E-21 : f32
    %34 = vector.broadcast %cst_15 : f32 to vector<8x32xf32>
    %35 = arith.maximumf %33, %34 : vector<8x32xf32>
    %36 = tpu.reciprocal %35 {approx = true} : vector<8x32xf32> -> vector<8x32xf32>
    %37 = arith.mulf %32, %36 : vector<8x32xf32>
    %38 = vector.extract_strided_slice %8 {offsets = [8, 0], sizes = [8, 32], strides = [1, 1]} : vector<16x32xf32> to vector<8x32xf32>
    %39 = vector.extract_strided_slice %9 {offsets = [8, 0], sizes = [8, 32], strides = [1, 1]} : vector<16x32xf32> to vector<8x32xf32>
    %40 = vector.extract_strided_slice %10 {offsets = [8, 0], sizes = [8, 32], strides = [1, 1]} : vector<16x32xf32> to vector<8x32xf32>
    %41 = arith.truncf %39 : vector<8x32xf32> to vector<8x32xbf16>
    %42 = tpu.concatenate %41, %41, %41, %41 in 0 : vector<8x32xbf16>, vector<8x32xbf16>, vector<8x32xbf16>, vector<8x32xbf16> -> vector<32x32xbf16>
    %43 = arith.mulf %42, %11 : vector<32x32xbf16>
    %44 = arith.truncf %40 : vector<8x32xf32> to vector<8x32xbf16>
    %45 = tpu.concatenate %44, %44, %44, %44 in 0 : vector<8x32xbf16>, vector<8x32xbf16>, vector<8x32xbf16>, vector<8x32xbf16> -> vector<32x32xbf16>
    %46 = arith.mulf %45, %12 : vector<32x32xbf16>
    %47 = arith.truncf %38 : vector<8x32xf32> to vector<8x32xbf16>
    "tpu.trace_start"() <{level = 10 : i32, message = "qc,jc->qj"}> : () -> ()
    %cst_16 = arith.constant dense<0.000000e+00> : vector<8x32xf32>
    %48 = tpu.matmul %47, %43, %cst_16 {dimension_numbers = #tpu.dot_dimension_numbers<[1], [1], [0], [0], [0, 0, 1, 0], [], []>} : vector<8x32xbf16>, vector<32x32xbf16>, vector<8x32xf32> -> vector<8x32xf32>
    "tpu.trace_stop"() : () -> ()
    %cst_17 = arith.constant 0.353553385 : f32
    %49 = vector.broadcast %cst_17 : f32 to vector<8x32xf32>
    %50 = arith.mulf %48, %49 : vector<8x32xf32>
    %cst_18 = arith.constant dense<0xFF800000> : vector<8xf32>
    %51 = vector.multi_reduction <maximumf>, %50, %cst_18 [1] : vector<8x32xf32> to vector<8xf32>
    %52 = vector.shape_cast %51 : vector<8xf32> to vector<8x1xf32>
    %53 = vector.broadcast %52 : vector<8x1xf32> to vector<8x32xf32>
    %54 = arith.subf %50, %53 : vector<8x32xf32>
    %55 = math.exp %54 : vector<8x32xf32>
    %56 = arith.truncf %55 : vector<8x32xf32> to vector<8x32xbf16>
    %cst_19 = arith.constant dense<0.000000e+00> : vector<8x32xf32>
    %57 = tpu.matmul %56, %46, %cst_19 {dimension_numbers = #tpu.dot_dimension_numbers<[1], [0], [0], [1], [0, 0, 1, 1], [], []>} : vector<8x32xbf16>, vector<32x32xbf16>, vector<8x32xf32> -> vector<8x32xf32>
    %cst_20 = arith.constant dense<0.000000e+00> : vector<8x32xf32>
    %58 = tpu.matmul %56, %12, %cst_20 {dimension_numbers = #tpu.dot_dimension_numbers<[1], [0], [0], [1], [0, 0, 1, 1], [], []>} : vector<8x32xbf16>, vector<32x32xbf16>, vector<8x32xf32> -> vector<8x32xf32>
    %cst_21 = arith.constant 9.99999968E-21 : f32
    %59 = vector.broadcast %cst_21 : f32 to vector<8x32xf32>
    %60 = arith.maximumf %58, %59 : vector<8x32xf32>
    %61 = tpu.reciprocal %60 {approx = true} : vector<8x32xf32> -> vector<8x32xf32>
    %62 = arith.mulf %57, %61 : vector<8x32xf32>
    %63 = tpu.concatenate %37, %62 in 0 : vector<8x32xf32>, vector<8x32xf32> -> vector<16x32xf32>
    %64 = arith.truncf %63 : vector<16x32xf32> to vector<16x32xbf16>
    %c0_22 = arith.constant 0 : index
    %c0_23 = arith.constant 0 : index
    %65 = vector.load %arg4[%c0_22, %c0_23] : memref<32x32xbf16, #tpu.memory_space<vmem>>, vector<32x32xbf16>
    %cst_24 = arith.constant dense<0.000000e+00> : vector<16x32xf32>
    %66 = tpu.matmul %64, %65, %cst_24 {dimension_numbers = #tpu.dot_dimension_numbers<[1], [0], [0], [1], [0, 0, 1, 1], [], []>} : vector<16x32xbf16>, vector<32x32xbf16>, vector<16x32xf32> -> vector<16x32xf32>
    %c0_25 = arith.constant 0 : index
    %c0_26 = arith.constant 0 : index
    %67 = vector.load %arg5[%c0_25, %c0_26] : memref<1x32xf32, #tpu.memory_space<vmem>>, vector<1x32xf32>
    %68 = vector.broadcast %67 : vector<1x32xf32> to vector<16x32xf32>
    %69 = arith.addf %66, %68 : vector<16x32xf32>
    %70 = arith.addf %69, %1 : vector<16x32xf32>
    %c0_27 = arith.constant 0 : index
    %c0_28 = arith.constant 0 : index
    %71 = vector.load %arg6[%c0_27, %c0_28] : memref<1x32xf32, #tpu.memory_space<vmem>>, vector<1x32xf32>
    %c0_29 = arith.constant 0 : index
    %c0_30 = arith.constant 0 : index
    %72 = vector.load %arg7[%c0_29, %c0_30] : memref<1x32xf32, #tpu.memory_space<vmem>>, vector<1x32xf32>
    %cst_31 = arith.constant dense<0.000000e+00> : vector<16xf32>
    %73 = vector.multi_reduction <add>, %70, %cst_31 [1] : vector<16x32xf32> to vector<16xf32>
    %74 = vector.shape_cast %73 : vector<16xf32> to vector<16x1xf32>
    %cst_32 = arith.constant 3.200000e+01 : f32
    %75 = vector.broadcast %cst_32 : f32 to vector<16x1xf32>
    %76 = arith.divf %74, %75 : vector<16x1xf32>
    %77 = vector.broadcast %76 : vector<16x1xf32> to vector<16x32xf32>
    %78 = arith.subf %70, %77 : vector<16x32xf32>
    %79 = arith.mulf %78, %78 : vector<16x32xf32>
    %cst_33 = arith.constant dense<0.000000e+00> : vector<16xf32>
    %80 = vector.multi_reduction <add>, %79, %cst_33 [1] : vector<16x32xf32> to vector<16xf32>
    %81 = vector.shape_cast %80 : vector<16xf32> to vector<16x1xf32>
    %cst_34 = arith.constant 3.200000e+01 : f32
    %82 = vector.broadcast %cst_34 : f32 to vector<16x1xf32>
    %83 = arith.divf %81, %82 : vector<16x1xf32>
    %84 = vector.broadcast %76 : vector<16x1xf32> to vector<16x32xf32>
    %85 = arith.subf %70, %84 : vector<16x32xf32>
    %cst_35 = arith.constant 9.99999997E-7 : f32
    %86 = vector.broadcast %cst_35 : f32 to vector<16x1xf32>
    %87 = arith.addf %83, %86 : vector<16x1xf32>
    %88 = math.rsqrt %87 : vector<16x1xf32>
    %89 = vector.broadcast %88 : vector<16x1xf32> to vector<16x32xf32>
    %90 = arith.mulf %85, %89 : vector<16x32xf32>
    %91 = vector.broadcast %71 : vector<1x32xf32> to vector<16x32xf32>
    %92 = arith.mulf %90, %91 : vector<16x32xf32>
    %93 = vector.broadcast %72 : vector<1x32xf32> to vector<16x32xf32>
    %94 = arith.addf %92, %93 : vector<16x32xf32>
    %95 = arith.truncf %94 : vector<16x32xf32> to vector<16x32xbf16>
    %c0_36 = arith.constant 0 : index
    %c0_37 = arith.constant 0 : index
    %96 = vector.load %arg8[%c0_36, %c0_37] : memref<32x64xbf16, #tpu.memory_space<vmem>>, vector<32x64xbf16>
    %cst_38 = arith.constant dense<0.000000e+00> : vector<16x64xf32>
    %97 = tpu.matmul %95, %96, %cst_38 {dimension_numbers = #tpu.dot_dimension_numbers<[1], [0], [0], [1], [0, 0, 1, 1], [], []>} : vector<16x32xbf16>, vector<32x64xbf16>, vector<16x64xf32> -> vector<16x64xf32>
    %c0_39 = arith.constant 0 : index
    %c0_40 = arith.constant 0 : index
    %98 = vector.load %arg9[%c0_39, %c0_40] : memref<1x64xf32, #tpu.memory_space<vmem>>, vector<1x64xf32>
    %99 = vector.broadcast %98 : vector<1x64xf32> to vector<16x64xf32>
    %100 = arith.addf %97, %99 : vector<16x64xf32>
    %cst_41 = arith.constant 0.000000e+00 : f32
    %101 = vector.broadcast %cst_41 : f32 to vector<16x64xf32>
    %102 = arith.maximumf %100, %101 : vector<16x64xf32>
    %103 = arith.truncf %102 : vector<16x64xf32> to vector<16x64xbf16>
    %c0_42 = arith.constant 0 : index
    %c0_43 = arith.constant 0 : index
    %104 = vector.load %arg10[%c0_42, %c0_43] : memref<64x32xbf16, #tpu.memory_space<vmem>>, vector<64x32xbf16>
    %cst_44 = arith.constant dense<0.000000e+00> : vector<16x32xf32>
    %105 = tpu.matmul %103, %104, %cst_44 {dimension_numbers = #tpu.dot_dimension_numbers<[1], [0], [0], [1], [0, 0, 1, 1], [], []>} : vector<16x64xbf16>, vector<64x32xbf16>, vector<16x32xf32> -> vector<16x32xf32>
    %c0_45 = arith.constant 0 : index
    %c0_46 = arith.constant 0 : index
    %106 = vector.load %arg11[%c0_45, %c0_46] : memref<1x32xf32, #tpu.memory_space<vmem>>, vector<1x32xf32>
    %107 = vector.broadcast %106 : vector<1x32xf32> to vector<16x32xf32>
    %108 = arith.addf %105, %107 : vector<16x32xf32>
    %109 = arith.addf %108, %94 : vector<16x32xf32>
    %c0_47 = arith.constant 0 : index
    %c0_48 = arith.constant 0 : index
    %110 = vector.load %arg12[%c0_47, %c0_48] : memref<1x32xf32, #tpu.memory_space<vmem>>, vector<1x32xf32>
    %c0_49 = arith.constant 0 : index
    %c0_50 = arith.constant 0 : index
    %111 = vector.load %arg13[%c0_49, %c0_50] : memref<1x32xf32, #tpu.memory_space<vmem>>, vector<1x32xf32>
    %cst_51 = arith.constant dense<0.000000e+00> : vector<16xf32>
    %112 = vector.multi_reduction <add>, %109, %cst_51 [1] : vector<16x32xf32> to vector<16xf32>
    %113 = vector.shape_cast %112 : vector<16xf32> to vector<16x1xf32>
    %cst_52 = arith.constant 3.200000e+01 : f32
    %114 = vector.broadcast %cst_52 : f32 to vector<16x1xf32>
    %115 = arith.divf %113, %114 : vector<16x1xf32>
    %116 = vector.broadcast %115 : vector<16x1xf32> to vector<16x32xf32>
    %117 = arith.subf %109, %116 : vector<16x32xf32>
    %118 = arith.mulf %117, %117 : vector<16x32xf32>
    %cst_53 = arith.constant dense<0.000000e+00> : vector<16xf32>
    %119 = vector.multi_reduction <add>, %118, %cst_53 [1] : vector<16x32xf32> to vector<16xf32>
    %120 = vector.shape_cast %119 : vector<16xf32> to vector<16x1xf32>
    %cst_54 = arith.constant 3.200000e+01 : f32
    %121 = vector.broadcast %cst_54 : f32 to vector<16x1xf32>
    %122 = arith.divf %120, %121 : vector<16x1xf32>
    %123 = vector.broadcast %115 : vector<16x1xf32> to vector<16x32xf32>
    %124 = arith.subf %109, %123 : vector<16x32xf32>
    %cst_55 = arith.constant 9.99999997E-7 : f32
    %125 = vector.broadcast %cst_55 : f32 to vector<16x1xf32>
    %126 = arith.addf %122, %125 : vector<16x1xf32>
    %127 = math.rsqrt %126 : vector<16x1xf32>
    %128 = vector.broadcast %127 : vector<16x1xf32> to vector<16x32xf32>
    %129 = arith.mulf %124, %128 : vector<16x32xf32>
    %130 = vector.broadcast %110 : vector<1x32xf32> to vector<16x32xf32>
    %131 = arith.mulf %129, %130 : vector<16x32xf32>
    %132 = vector.broadcast %111 : vector<1x32xf32> to vector<16x32xf32>
    %133 = arith.addf %131, %132 : vector<16x32xf32>
    %134 = vector.shape_cast %133 : vector<16x32xf32> to vector<2x8x32xf32>
    %c0_56 = arith.constant 0 : index
    %c0_57 = arith.constant 0 : index
    %c0_58 = arith.constant 0 : index
    %135 = vector.load %arg16[%c0_56, %c0_57, %c0_58] : memref<2x8x32xf32, #tpu.memory_space<vmem>>, vector<2x8x32xf32>
    tpu.vector_store %arg16[%c0_56, %c0_57, %c0_58], %134 {strides = array<i32>} : memref<2x8x32xf32, #tpu.memory_space<vmem>>, vector<2x8x32xf32>,
    return
  }
  func.func @transform_0(%arg0: i32) -> (i32, i32, i32) {
    %c0_i32 = arith.constant 0 : i32
    %c0_i32_0 = arith.constant 0 : i32
    %c0_i32_1 = arith.constant 0 : i32
    return %arg0, %c0_i32, %c0_i32_0 : i32, i32, i32
  }
  func.func @transform_1(%arg0: i32) -> (i32, i32) {
    %c0_i32 = arith.constant 0 : i32
    %c0_i32_0 = arith.constant 0 : i32
    %c0_i32_1 = arith.constant 0 : i32
    return %c0_i32, %c0_i32_0 : i32, i32
  }
  func.func @transform_2(%arg0: i32) -> (i32, i32) {
    %c0_i32 = arith.constant 0 : i32
    %c0_i32_0 = arith.constant 0 : i32
    %c0_i32_1 = arith.constant 0 : i32
    return %c0_i32, %c0_i32_0 : i32, i32
  }
  func.func @transform_3(%arg0: i32) -> (i32, i32) {
    %c0_i32 = arith.constant 0 : i32
    %c0_i32_0 = arith.constant 0 : i32
    %c0_i32_1 = arith.constant 0 : i32
    return %c0_i32, %c0_i32_0 : i32, i32
  }
  func.func @transform_4(%arg0: i32) -> (i32, i32) {
    %c0_i32 = arith.constant 0 : i32
    %c0_i32_0 = arith.constant 0 : i32
    %c0_i32_1 = arith.constant 0 : i32
    return %c0_i32, %c0_i32_0 : i32, i32
  }
  func.func @transform_5(%arg0: i32) -> (i32, i32) {
    %c0_i32 = arith.constant 0 : i32
    %c0_i32_0 = arith.constant 0 : i32
    %c0_i32_1 = arith.constant 0 : i32
    return %c0_i32, %c0_i32_0 : i32, i32
  }
  func.func @transform_6(%arg0: i32) -> (i32, i32) {
    %c0_i32 = arith.constant 0 : i32
    %c0_i32_0 = arith.constant 0 : i32
    %c0_i32_1 = arith.constant 0 : i32
    return %c0_i32, %c0_i32_0 : i32, i32
  }
  func.func @transform_7(%arg0: i32) -> (i32, i32) {
    %c0_i32 = arith.constant 0 : i32
    %c0_i32_0 = arith.constant 0 : i32
    %c0_i32_1 = arith.constant 0 : i32
    return %c0_i32, %c0_i32_0 : i32, i32
  }
  func.func @transform_8(%arg0: i32) -> (i32, i32) {
    %c0_i32 = arith.constant 0 : i32
    %c0_i32_0 = arith.constant 0 : i32
    %c0_i32_1 = arith.constant 0 : i32
    return %c0_i32, %c0_i32_0 : i32, i32
  }
  func.func @transform_9(%arg0: i32) -> (i32, i32) {
    %c0_i32 = arith.constant 0 : i32
    %c0_i32_0 = arith.constant 0 : i32
    %c0_i32_1 = arith.constant 0 : i32
    return %c0_i32, %c0_i32_0 : i32, i32
  }
  func.func @transform_10(%arg0: i32) -> (i32, i32) {
    %c0_i32 = arith.constant 0 : i32
    %c0_i32_0 = arith.constant 0 : i32
    %c0_i32_1 = arith.constant 0 : i32
    return %c0_i32, %c0_i32_0 : i32, i32
  }
  func.func @transform_11(%arg0: i32) -> (i32, i32) {
    %c0_i32 = arith.constant 0 : i32
    %c0_i32_0 = arith.constant 0 : i32
    %c0_i32_1 = arith.constant 0 : i32
    return %c0_i32, %c0_i32_0 : i32, i32
  }
  func.func @transform_12(%arg0: i32) -> (i32, i32) {
    %c0_i32 = arith.constant 0 : i32
    %c0_i32_0 = arith.constant 0 : i32
    %c0_i32_1 = arith.constant 0 : i32
    return %c0_i32, %c0_i32_0 : i32, i32
  }
  func.func @transform_13(%arg0: i32) -> (i32, i32) {
    %c0_i32 = arith.constant 0 : i32
    %c0_i32_0 = arith.constant 0 : i32
    %c0_i32_1 = arith.constant 0 : i32
    return %c0_i32, %c0_i32_0 : i32, i32
  }
  func.func @transform_14(%arg0: i32) -> (i32, i32) {
    %c0_i32 = arith.constant 0 : i32
    %c0_i32_0 = arith.constant 0 : i32
    %c0_i32_1 = arith.constant 0 : i32
    return %c0_i32, %c0_i32_0 : i32, i32
  }
  func.func @transform_15(%arg0: i32) -> (i32, i32, i32) {
    %c0_i32 = arith.constant 0 : i32
    %c0_i32_0 = arith.constant 0 : i32
    %c0_i32_1 = arith.constant 0 : i32
    return %arg0, %c0_i32, %c0_i32_0 : i32, i32, i32
  }
}

</mosaic_0001>

<bundles_post_ra>
// kernel: tpu_custom_call.1
= control target key start
LH: loop header
LB: loop body
LE: loop exit
PB: predicated region body
PF: predicated region fallthrough
CT: control target
= control target key end

     0   :  { %20 = vsyncpa [#allocation3], 0  ;;  %s1585_s0 = inlined_call_operand.vmem [shape: f32[2,8,32], index: 0, kind: input, shape index: {}]   ;;  %s1586_s1 = inlined_call_operand.vmem [shape: bf16[32,96], index: 1, kind: input, shape index: {}]   ;;  %s1587_s2 = inlined_call_operand.hbm [shape: f32[1,96], index: 2, kind: input, shape index: {}]   ;;  %s1588_s3 = inlined_call_operand.vmem [shape: bf16[32,32], index: 3, kind: input, shape index: {}]   ;;  %s1589_s4 = inlined_call_operand.hbm [shape: f32[1,32], index: 4, kind: input, shape index: {}]   ;;  %s1590_s5 = inlined_call_operand.hbm [shape: f32[1,32], index: 5, kind: input, shape index: {}]   ;;  %s1591_s6 = inlined_call_operand.hbm [shape: f32[1,32], index: 6, kind: input, shape index: {}]   ;;  %s1592_s7 = inlined_call_operand.hbm [shape: bf16[32,64], index: 7, kind: input, shape index: {}]   ;;  %s1593_s8 = inlined_call_operand.hbm [shape: f32[1,64], index: 8, kind: input, shape index: {}]   ;;  %s1594_s9 = inlined_call_operand.vmem [shape: bf16[64,32], index: 9, kind: input, shape index: {}]   ;;  %s1595_s10 = inlined_call_operand.vmem [shape: f32[1,32], index: 10, kind: input, shape index: {}]   ;;  %s1596_s11 = inlined_call_operand.vmem [shape: f32[1,32], index: 11, kind: input, shape index: {}]   ;;  %s1597_s12 = inlined_call_operand.vmem [shape: f32[1,32], index: 12, kind: input, shape index: {}]   ;;  %s1598_s13 = inlined_call_operand.hbm [shape: bf16[32,32], index: 13, kind: input, shape index: {}]   ;;  %s1599_s14 = inlined_call_operand.hbm [shape: bf16[32,32], index: 14, kind: input, shape index: {}]   ;;  %s1600_s15 = inlined_call_operand.hbm [shape: f32[2,8,32], index: 15, kind: output, shape index: {}]  }
   0x1   :  { %21 = vsyncpa [#allocation6], 0 }
   0x2   :  { %22 = vsyncpa [#allocation9], 0 }
   0x3   :  { %23 = vsyncpa [#allocation12], 0 }
   0x4   :  { %24 = vsyncpa [#allocation15], 0 }
   0x5   :  { %25 = vsyncpa [#allocation4], 0  ;;  %s1325_s18 = smov [#allocation5]   ;;  %s1326_s20 = smov [#allocation8]  }
   0x6   :  { %s48_s19 = sshll.u32 %s1325_s18, 4  ;;  %s68_s21 = sshll.u32 %s1326_s20, 4  ;;  %s49_s19 = int_to_ptr.vmem [resolvable:$true] %s48_s19  ;;  %s69_s21 = int_to_ptr.vmem [resolvable:$true] %s68_s21 }
   0x7   :  { %s1141_s22 = scalar_lea.vmem %s49_s19, 16  ;;  %s1145_s23 = scalar_lea.vmem %s49_s19, 32 }
   0x8   :  { %p1142_p0 = scmp.ne.s32.totalorder %s49_s19, %s1141_s22  ;;  %p1146_p1 = scmp.lt.s32.totalorder %s49_s19, %s49_s19 }
   0x9   :  { %p1147_p2 = scmp.lt.s32.totalorder %s1145_s23, %s1141_s22 }
   0xb   :  { %p1148_p3 = por %p1147_p2, %p1146_p1 }
   0xd   :  { %p1149_p4 = pnand %p1148_p3, %p1142_p0 }
   0xf   :  { %1152 = shalt.err (!%p1149_p4)
}
  0x10   :  { %51 = dma.hbm_to_vmem [thread:$0]  %s1589_s4, 16, %s49_s19, [#allocation6]  }
  0x11   :  { %s1161_s26 = scalar_lea.vmem %s69_s21, 16  ;;  %s1165_s27 = scalar_lea.vmem %s69_s21, 32 }
  0x12   :  { %p1162_p5 = scmp.ne.s32.totalorder %s69_s21, %s1161_s26  ;;  %p1166_p6 = scmp.lt.s32.totalorder %s69_s21, %s69_s21 }
  0x13   :  { %p1167_p7 = scmp.lt.s32.totalorder %s1165_s27, %s1161_s26 }
  0x15   :  { %p1168_p8 = por %p1167_p7, %p1166_p6 }
  0x17   :  { %p1169_p9 = pnand %p1168_p8, %p1162_p5 }
  0x19   :  { %1172 = shalt.err (!%p1169_p9)
}
  0x1a   :  { %71 = dma.hbm_to_vmem [thread:$0]  %s1591_s6, 16, %s69_s21, [#allocation9]  }
  0x1b   :  { %s1327_s30 = smov [#allocation11]   ;;  %s1328_s17 = smov [#allocation2]  }
  0x1c   :  { %s90_s16 = sshll.u32 %s1327_s30, 4  ;;  %s36_s18 = sshll.u32 %s1328_s17, 4  ;;  %s91_s16 = int_to_ptr.vmem [resolvable:$true] %s90_s16  ;;  %s37_s18 = int_to_ptr.vmem [resolvable:$true] %s36_s18 }
  0x1d   :  { %s1181_s20 = scalar_lea.vmem %s91_s16, 16  ;;  %s1185_s4 = scalar_lea.vmem %s91_s16, 32 }
  0x1e   :  { %p1182_p10 = scmp.ne.s32.totalorder %s91_s16, %s1181_s20  ;;  %p1186_p11 = scmp.lt.s32.totalorder %s91_s16, %s91_s16 }
  0x1f   :  { %p1187_p12 = scmp.lt.s32.totalorder %s1185_s4, %s1181_s20 }
  0x21   :  { %p1188_p13 = por %p1187_p12, %p1186_p11 }
  0x23   :  { %p1189_p0 = pnand %p1188_p13, %p1182_p10 }
  0x25   :  { %1192 = shalt.err (!%p1189_p0)
}
  0x26   :  { %93 = dma.hbm_to_vmem [thread:$0]  %s1593_s8, 16, %s91_s16, [#allocation12]  }
  0x27   :  { %s1201_s23 = scalar_lea.vmem %s37_s18, 16  ;;  %s1205_s6 = scalar_lea.vmem %s37_s18, 32 }
  0x28   :  { %p1202_p1 = scmp.ne.s32.totalorder %s37_s18, %s1201_s23  ;;  %p1206_p2 = scmp.lt.s32.totalorder %s37_s18, %s37_s18 }
  0x29   :  { %p1207_p3 = scmp.lt.s32.totalorder %s1205_s6, %s1201_s23 }
  0x2b   :  { %p1208_p4 = por %p1207_p3, %p1206_p2 }
  0x2d   :  { %p1209_p5 = pnand %p1208_p4, %p1202_p1 }
  0x2f   :  { %1212 = shalt.err (!%p1209_p5)
}
  0x30   :  { %39 = dma.hbm_to_vmem [thread:$0]  %s1587_s2, 16, %s37_s18, [#allocation3]  }
  0x31   :  { %s1329_s25 = smov [#allocation7]   ;;  %s1330_s27 = smov [#allocation10]  }
  0x32   :  { %s58_s26 = sshll.u32 %s1329_s25, 4  ;;  %s77_s28 = sshll.u32 %s1330_s27, 4  ;;  %s59_s26 = int_to_ptr.vmem [resolvable:$true] %s58_s26  ;;  %s78_s28 = int_to_ptr.vmem [resolvable:$true] %s77_s28 }
  0x33   :  { %s1221_s29 = scalar_lea.vmem %s59_s26, 16  ;;  %s1225_s8 = scalar_lea.vmem %s59_s26, 32 }
  0x34   :  { %p1222_p6 = scmp.ne.s32.totalorder %s59_s26, %s1221_s29  ;;  %p1226_p7 = scmp.lt.s32.totalorder %s59_s26, %s59_s26 }
  0x35   :  { %p1227_p8 = scmp.lt.s32.totalorder %s1225_s8, %s1221_s29 }
  0x37   :  { %p1228_p9 = por %p1227_p8, %p1226_p7 }
  0x39   :  { %p1229_p10 = pnand %p1228_p9, %p1222_p6 }
  0x3b   :  { %1232 = shalt.err (!%p1229_p10)
}
  0x3c   :  { %61 = dma.hbm_to_vmem [thread:$0]  %s1590_s5, 16, %s59_s26, [#allocation6]  }
  0x3d   :  { %s1241_s17 = scalar_lea.vmem %s78_s28, 256  ;;  %p1246_p12 = scmp.lt.s32.totalorder %s78_s28, %s78_s28 }
  0x3e   :  { %p1242_p11 = scmp.ne.s32.totalorder %s78_s28, %s1241_s17  ;;  %p1247_p13 = scmp.lt.s32.totalorder %s1241_s17, %s1241_s17 }
  0x40   :  { %p1248_p0 = por %p1247_p13, %p1246_p12 }
  0x42   :  { %p1249_p1 = pnand %p1248_p0, %p1242_p11 }
  0x44   :  { %1252 = shalt.err (!%p1249_p1)
}
  0x45   :  { %s1331_s2 = smov 64   ;;  %s1332_s18 = smov 4  }
  0x46   :  { %83 = dma.hbm_to_vmem [thread:$0]  %s1592_s7, 256, %s78_s28, [#allocation9], %s1331_s2, %s1331_s2, %s1332_s18  }
  0x47   :  { %s1333_s19 = smov [#allocation13]   ;;  %s1334_s23 = smov [#allocation14]  }
  0x48   :  { %s107_s22 = sshll.u32 %s1333_s19, 4  ;;  %s119_s6 = sshll.u32 %s1334_s23, 4  ;;  %s108_s22 = int_to_ptr.vmem [resolvable:$true] %s107_s22  ;;  %s120_s6 = int_to_ptr.vmem [resolvable:$true] %s119_s6 }
  0x49   :  { %s1261_s5 = scalar_lea.vmem %s108_s22, 256  ;;  %p1266_p3 = scmp.lt.s32.totalorder %s108_s22, %s108_s22 }
  0x4a   :  { %p1262_p2 = scmp.ne.s32.totalorder %s108_s22, %s1261_s5  ;;  %p1267_p4 = scmp.lt.s32.totalorder %s1261_s5, %s1261_s5 }
  0x4c   :  { %p1268_p5 = por %p1267_p4, %p1266_p3 }
  0x4e   :  { %p1269_p6 = pnand %p1268_p5, %p1262_p2 }
  0x50   :  { %1272 = shalt.err (!%p1269_p6)
}
  0x51   :  { %113 = dma.hbm_to_vmem [thread:$0]  %s1598_s13, 256, %s108_s22, [#allocation12], %s1331_s2, %s1331_s2, %s1332_s18  }
  0x52   :  { %s1281_s7 = scalar_lea.vmem %s120_s6, 256  ;;  %p1286_p8 = scmp.lt.s32.totalorder %s120_s6, %s120_s6 }
  0x53   :  { %p1282_p7 = scmp.ne.s32.totalorder %s120_s6, %s1281_s7  ;;  %p1287_p9 = scmp.lt.s32.totalorder %s1281_s7, %s1281_s7 }
  0x55   :  { %p1288_p10 = por %p1287_p9, %p1286_p8 }
  0x57   :  { %p1289_p11 = pnand %p1288_p10, %p1282_p7 }
  0x59   :  { %1292 = shalt.err (!%p1289_p11)
}
  0x5a   :  { %125 = dma.hbm_to_vmem [thread:$0]  %s1599_s14, 256, %s120_s6, [#allocation15], %s1331_s2, %s1331_s2, %s1332_s18  }
  0x5b   :  { %1313 = dma.done.wait [#allocation3], 16  }
  0x5c   :  { %1314 = vsyncadd [#allocation3], 4294967280 }
  0x5d   :  { %1315 = dma.done.wait [#allocation6], 32  }
  0x5e   :  { %1316 = vsyncadd [#allocation6], 4294967264 }
  0x5f   :  { %1317 = dma.done.wait [#allocation9], 272  }
  0x60   :  { %1318 = vsyncadd [#allocation9], 4294967024 }
  0x61   :  { %1319 = dma.done.wait [#allocation12], 272  }
  0x62   :  { %1320 = vsyncadd [#allocation12], 4294967024 }
  0x63   :  { %1321 = dma.done.wait [#allocation15], 256  }
  0x64   :  { %1322 = vsyncadd [#allocation15], 4294967040  ;;  %v1335_v0 = vmov 0.0   ;;  %vm1336_vm0 = vmmov 0   ;;  %v1103_v1 = vld [vmem:[%s1586_s1 + $0x8] sm:$0xff]   ;;  %v1104_v2 = vld [vmem:[%s1586_s1] sm:$0xff]  }
  0x65   :  { %1002 = vmatprep.subr.bf16.mxu0 %v1335_v0  ;;  %1006 = vmatprep.mubr.msk.bf16.mxu0 %vm1336_vm0, %v1335_v0  ;;  %v1467_v3 = vld [vmem:[%s1585_s0] sm:$0xff]  ;;  %v1472_v4 = vld [vmem:[%s1585_s0 + $0x8] sm:$0xff]  ;;  %vm177_vm1 = vcmask 261120   ;;  %s1337_s1 = smov 32   ;;  %vm233_vm2 = vcmask 1043456   ;;  %s1338_s0 = smov 96  }
  0x66   :  { %1010 = vmatprep.subr.bf16.mxu1 %v1335_v0  ;;  %1014 = vmatprep.mubr.msk.bf16.mxu1 %vm1336_vm0, %v1335_v0  ;;  %v1105_v5 = vld [vmem:[#allocation13 + $0x8] sm:$0xff]   ;;  %v1106_v6 = vld [vmem:[#allocation13] sm:$0xff]   ;;  %v153_v7 = vpack.c.bf16 %v1472_v4, %v1467_v3  ;;  %v1481_v26 = vld [vmem:[#allocation14 + $0x8] sm:$0xff]   ;;  %vm824_vm3 = vcmask 523264   ;;  %s1339_s13 = smov [#allocation16]  }
  0x67   :  { %1003 = vmatpush3.bf16.msra.mxu0 %v1103_v1  ;;  %250 = vrot.lane.b32.xlu0 %v1105_v5, %s1337_s1  ;;  %v938_v8 = vld [vmem:[#allocation2] ss:$0 sm:$0xff]  ;;  %v1485_v28 = vld [vmem:[#allocation14] sm:$0xff]   ;;  %s922_s14 = sshll.u32 %s1339_s13, 4  ;;  %s923_s14 = int_to_ptr.vmem [resolvable:$true] %s922_s14 }
  0x68   :  { %1004 = vmatprep.subr.bf16.mxu0 %v1335_v0  ;;  %s1293_s27 = scalar_lea.vmem %s923_s14, 256  ;;  %p1298_p13 = scmp.lt.s32.totalorder %s923_s14, %s923_s14 }
  0x69   :  { %p1294_p12 = scmp.ne.s32.totalorder %s923_s14, %s1293_s27  ;;  %p1299_p0 = scmp.lt.s32.totalorder %s1293_s27, %s1293_s27 }
  0x6b   :  { %1005 = vmatpush3.bf16.msra.mxu0 %v1104_v2  ;;  %248 = vrot.lane.b32.xlu0 %v1106_v6, %s1337_s1  ;;  %p1300_p1 = por %p1299_p0, %p1298_p13 }
  0x6c   :  { %1018 = vmatprep.subr.bf16.mxu0 %v1335_v0 }
  0x6d   :  { %p1301_p2 = pnand %p1300_p1, %p1294_p12 }
  0x6e   :  { %1007 = vmatmul.mubr.msk.bf16.vlgmr.msra.gmra.mxu0 %vm177_vm1, %v153_v7 }
  0x6f   :  { %1022 = vmatprep.mubr.msk.bf16.mxu0 %vm1336_vm0, %v1335_v0 }
  0xd9   :  { %v251_v13 = vpop.permute.xlu0 %250 }
  0xdd   :  { %v249_v22 = vpop.permute.xlu0 %248 }
 0x12e   :  { %v215_v9 = vpop.f32.mrf.mxu0 }
 0x12f   :  { %v216_v10 = vadd.f32 %v938_v8, %v215_v9  ;;  %v1110_v9 = vld [vmem:[%s1588_s3] sm:$0xff]  }
 0x130   :  { %v1008_v11 = vpop.f32.mrf.mxu0 }
 0x131   :  { %v230_v12 = vpack.c.bf16 %v216_v10, %v216_v10 }
 0x132   :  { %v218_v14 = vpop.f32.mrf.mxu0 }
 0x133   :  { %v232_v15 = vrot.slane %v230_v12, 4  ;;  %v219_v16 = vadd.f32 %v938_v8, %v218_v14  ;;  %v1109_v8 = vld [vmem:[%s1588_s3 + $0x8] sm:$0xff]  }
 0x134   :  { %v1009_v17 = vpop.f32.mrf.mxu0 }
 0x135   :  { %v236_v18 = vsel %vm233_vm2, %v230_v12, %v232_v15  ;;  %v432_v19 = vpack.c.bf16 %v219_v16, %v219_v16 }
 0x136   :  { %v255_v20 = vmul.bf16 %v251_v13, %v236_v18  ;;  %v254_v24 = vmul.bf16 %v249_v22, %v236_v18 }
 0x137   :  { %v434_v21 = vrot.slane %v432_v19, 4 }
 0x138   :  { %278 = vrot.lane.b32.xlu1 %v255_v20, %s1338_s0 }
 0x139   :  { %v437_v23 = vsel %vm233_vm2, %v432_v19, %v434_v21 }
 0x13a   :  { %v440_v25 = vmul.bf16 %v437_v23, %v251_v13  ;;  %v439_v27 = vmul.bf16 %v437_v23, %v249_v22 }
 0x13c   :  { %276 = vrot.lane.b32.xlu1 %v254_v24, %s1338_s0  ;;  %447 = vrot.lane.b32.xlu0 %v440_v25, %s1338_s0 }
 0x140   :  { %268 = vrot.lane.b32.xlu0 %v1481_v26, %s1331_s2  ;;  %445 = vrot.lane.b32.xlu1 %v439_v27, %s1338_s0 }
 0x144   :  { %266 = vrot.lane.b32.xlu1 %v1485_v28, %s1331_s2 }
 0x1aa   :  { %v279_v29 = vpop.permute.xlu1 %278 }
 0x1ab   :  { %v286_v30 = vsel %vm177_vm1, %v279_v29, 0 }
 0x1ac   :  { %1011 = vmatpush3.bf16.xpose.msra.mxu1 %v286_v30 }
 0x1ad   :  { %1012 = vmatprep.subr.bf16.mxu1 %v1335_v0 }
 0x1ae   :  { %v277_v31 = vpop.permute.xlu1 %276  ;;  %v448_v36 = vpop.permute.xlu0 %447 }
 0x1af   :  { %v283_v33 = vsel %vm177_vm1, %v277_v31, 0  ;;  %v455_v37 = vsel %vm177_vm1, %v448_v36, 0 }
 0x1b2   :  { %v446_v32 = vpop.permute.xlu1 %445  ;;  %v269_v50 = vpop.permute.xlu0 %268 }
 0x1b3   :  { %v452_v38 = vsel %vm177_vm1, %v446_v32, 0  ;;  %v273_v52 = vmul.bf16 %v269_v50, %v236_v18  ;;  %v442_v53 = vmul.bf16 %v437_v23, %v269_v50 }
 0x1b4   :  { %1013 = vmatpush3.bf16.xpose.msra.mxu1 %v283_v33  ;;  %v952_v33 = vld [vmem:[#allocation5] ss:$0 sm:$0xff] }
 0x1b5   :  { %1034 = vmatprep.subr.bf16.mxu1 %v1335_v0 }
 0x1b6   :  { %v267_v34 = vpop.permute.xlu1 %266 }
 0x1b7   :  { %v272_v35 = vmul.bf16 %v267_v34, %v236_v18  ;;  %v441_v54 = vmul.bf16 %v437_v23, %v267_v34 }
 0x1b9   :  { %338 = vrot.lane.b32.xlu1 %v272_v35, %s1331_s2 }
 0x1bb   :  { %1015 = vmatmul.mubr.msk.bf16.vlgmr.msra.gmra.mxu1 %vm177_vm1, %v230_v12 }
 0x1bc   :  { %1035 = vmatpush3.bf16.xpose.msra.mxu1 %v455_v37  ;;  %1038 = vmatprep.mubr.msk.bf16.mxu1 %vm1336_vm0, %v1335_v0 }
 0x1bd   :  { %1036 = vmatprep.subr.bf16.mxu1 %v1335_v0 }
 0x1c4   :  { %1037 = vmatpush3.bf16.xpose.msra.mxu1 %v452_v38 }
 0x1c5   :  { %1058 = vmatprep.subr.bf16.mxu1 %v1335_v0 }
 0x1cb   :  { %1039 = vmatmul.mubr.msk.bf16.vlgmr.msra.gmra.mxu1 %vm177_vm1, %v432_v19 }
 0x1cc   :  { %1062 = vmatprep.mubr.msk.bf16.mxu1 %vm1336_vm0, %v1335_v0  ;;  %1059 = vmatpush3.bf16.msra.mxu1 %v1109_v8 }
 0x1cd   :  { %1060 = vmatprep.subr.bf16.mxu1 %v1335_v0 }
 0x1d0   :  { %1061 = vmatpush3.bf16.msra.mxu1 %v1110_v9 }
 0x1d1   :  { %1074 = vmatprep.subr.bf16.mxu1 %v1335_v0 }
 0x22b   :  { %v339_v59 = vpop.permute.xlu1 %338 }
 0x27b   :  { %v322_v39 = vpop.f32.mrf.mxu1 }
 0x27c   :  { %v328_v40 = vmul.f32 0.35355338, %v322_v39 }
 0x27d   :  { %v1016_v41 = vpop.f32.mrf.mxu1 }
 0x27e   :  { %v329_v42 = vsel %vm177_vm1, %v328_v40, -inf }
 0x27f   :  { %v325_v43 = vpop.f32.mrf.mxu1  ;;  %330 = vmax.xlane.f32.xlu0 %v329_v42 }
 0x281   :  { %v1017_v44 = vpop.f32.mrf.mxu1 }
 0x28b   :  { %v491_v45 = vpop.f32.mrf.mxu1 }
 0x28c   :  { %v497_v46 = vmul.f32 0.35355338, %v491_v45 }
 0x28d   :  { %v1040_v47 = vpop.f32.mrf.mxu1 }
 0x28e   :  { %v498_v48 = vsel %vm177_vm1, %v497_v46, -inf }
 0x28f   :  { %v494_v49 = vpop.f32.mrf.mxu1  ;;  %499 = vmax.xlane.f32.xlu1 %v498_v48 }
 0x291   :  { %v1041_v51 = vpop.f32.mrf.mxu1 }
 0x295   :  { %340 = vrot.lane.b32.xlu0 %v273_v52, %s1331_s2 }
 0x299   :  { %509 = vrot.lane.b32.xlu0 %v442_v53, %s1331_s2  ;;  %v1111_v53 = vld [vmem:[#allocation10 + $0x8] sm:$0xff]  }
 0x2a0   :  { %507 = vrot.lane.b32.xlu1 %v441_v54, %s1331_s2  ;;  %v1113_v54 = vld [vmem:[%s1594_s9 + $0x18] sm:$0xff]  }
 0x308   :  { %v331_v55 = vpop.xlane.xlu0 %330 }
 0x309   :  { %v332_v56 = vsub.f32 %v328_v40, %v331_v55 }
 0x30b   :  { %v333_v57 = vmul.f32 1.442695, %v332_v56 }
 0x30c   :  { %v341_v58 = vpop.permute.xlu0 %340 }
 0x30d   :  { %1117 = vpow2.f32 %v333_v57  ;;  %1019 = vmatpush3.bf16.msra.mxu0 %v341_v58 }
 0x30e   :  { %1020 = vmatprep.subr.bf16.mxu0 %v1335_v0 }
 0x310   :  { %v510_v2 = vpop.permute.xlu0 %509 }
 0x311   :  { %1021 = vmatpush3.bf16.msra.mxu0 %v339_v59 }
 0x312   :  { %1026 = vmatprep.subr.bf16.mxu0 %v1335_v0 }
 0x318   :  { %v500_v60 = vpop.xlane.xlu1 %499 }
 0x319   :  { %v501_v61 = vsub.f32 %v497_v46, %v500_v60 }
 0x31a   :  { %v1118_v62 = vpop.eup %1117 }
 0x31b   :  { %v335_v63 = vpack.c.bf16 %v1118_v62, %v1118_v62  ;;  %v502_v1 = vmul.f32 1.442695, %v501_v61 }
 0x31c   :  { %v508_v5 = vpop.permute.xlu1 %507 }
 0x31d   :  { %1119 = vpow2.f32 %v502_v1  ;;  %1023 = vmatmul.mubr.msk.bf16.vlgmr.msra.gmra.mxu0 %vm177_vm1, %v335_v63 }
 0x31e   :  { %1027 = vmatpush3.bf16.msra.mxu0 %v1481_v26  ;;  %1030 = vmatprep.mubr.msk.bf16.mxu0 %vm1336_vm0, %v1335_v0 }
 0x31f   :  { %1028 = vmatprep.subr.bf16.mxu0 %v1335_v0 }
 0x322   :  { %1029 = vmatpush3.bf16.msra.mxu0 %v1485_v28 }
 0x323   :  { %1042 = vmatprep.subr.bf16.mxu0 %v1335_v0 }
 0x325   :  { %1031 = vmatmul.mubr.msk.bf16.vlgmr.msra.gmra.mxu0 %vm177_vm1, %v335_v63  ;;  %v956_v63 = vld [vmem:[#allocation7] ss:$0 sm:$0xff] }
 0x326   :  { %1043 = vmatpush3.bf16.msra.mxu0 %v510_v2  ;;  %1046 = vmatprep.mubr.msk.bf16.mxu0 %vm1336_vm0, %v1335_v0 }
 0x327   :  { %1044 = vmatprep.subr.bf16.mxu0 %v1335_v0 }
 0x32a   :  { %v1120_v6 = vpop.eup %1119  ;;  %1045 = vmatpush3.bf16.msra.mxu0 %v508_v5 }
 0x32b   :  { %v504_v7 = vpack.c.bf16 %v1120_v6, %v1120_v6  ;;  %1050 = vmatprep.subr.bf16.mxu0 %v1335_v0  ;;  %v957_v6 = vld [vmem:[#allocation8] ss:$0 sm:$0xff] }
 0x32d   :  { %1047 = vmatmul.mubr.msk.bf16.vlgmr.msra.gmra.mxu0 %vm177_vm1, %v504_v7 }
 0x32e   :  { %1051 = vmatpush3.bf16.msra.mxu0 %v1481_v26  ;;  %1054 = vmatprep.mubr.msk.bf16.mxu0 %vm1336_vm0, %v1335_v0 }
 0x32f   :  { %1052 = vmatprep.subr.bf16.mxu0 %v1335_v0 }
 0x332   :  { %1053 = vmatpush3.bf16.msra.mxu0 %v1485_v28 }
 0x333   :  { %1066 = vmatprep.subr.bf16.mxu0 %v1335_v0 }
 0x335   :  { %1055 = vmatmul.mubr.msk.bf16.vlgmr.msra.gmra.mxu0 %vm177_vm1, %v504_v7 }
 0x336   :  { %1070 = vmatprep.mubr.msk.bf16.mxu0 %vm1336_vm0, %v1335_v0  ;;  %1067 = vmatpush3.bf16.msra.mxu0 %v1111_v53 }
 0x337   :  { %1068 = vmatprep.subr.bf16.mxu0 %v1335_v0 }
 0x3dd   :  { %v381_v10 = vpop.f32.mrf.mxu0 }
 0x3df   :  { %v1024_v11 = vpop.f32.mrf.mxu0 }
 0x3e0   :  { %v1114_v11 = vld [vmem:[%s1594_s9 + $0x10] sm:$0xff]  }
 0x3e1   :  { %v384_v12 = vpop.f32.mrf.mxu0 }
 0x3e2   :  { %v1115_v12 = vld [vmem:[%s1594_s9 + $0x8] sm:$0xff]  }
 0x3e3   :  { %v1025_v13 = vpop.f32.mrf.mxu0 }
 0x3e4   :  { %v1116_v13 = vld [vmem:[%s1594_s9] sm:$0xff]  }
 0x3e5   :  { %v423_v14 = vpop.f32.mrf.mxu0 }
 0x3e6   :  { %v429_v21 = vmax.f32 %v423_v14, 1e-20  ;;  %v958_v14 = vld [vmem:[#allocation11] ss:$0 sm:$0xff] }
 0x3e7   :  { %v1032_v15 = vpop.f32.mrf.mxu0 }
 0x3e8   :  { %1121 = vrcp.f32 %v429_v21 }
 0x3e9   :  { %v426_v16 = vpop.f32.mrf.mxu0 }
 0x3eb   :  { %v1033_v17 = vpop.f32.mrf.mxu0 }
 0x3ed   :  { %v550_v18 = vpop.f32.mrf.mxu0 }
 0x3ef   :  { %v1048_v19 = vpop.f32.mrf.mxu0 }
 0x3f1   :  { %v553_v20 = vpop.f32.mrf.mxu0 }
 0x3f3   :  { %v1049_v22 = vpop.f32.mrf.mxu0 }
 0x3f5   :  { %v590_v23 = vpop.f32.mrf.mxu0  ;;  %v1122_v28 = vpop.eup %1121 }
 0x3f6   :  { %v596_v24 = vmax.f32 %v590_v23, 1e-20  ;;  %v431_v30 = vmul.f32 %v1122_v28, %v381_v10 }
 0x3f7   :  { %v1056_v25 = vpop.f32.mrf.mxu0 }
 0x3f8   :  { %1123 = vrcp.f32 %v596_v24 }
 0x3f9   :  { %v593_v26 = vpop.f32.mrf.mxu0 }
 0x3fb   :  { %v1057_v27 = vpop.f32.mrf.mxu0 }
 0x405   :  { %v1124_v29 = vpop.eup %1123 }
 0x406   :  { %v598_v31 = vmul.f32 %v1124_v29, %v550_v18 }
 0x408   :  { %v599_v32 = vpack.c.bf16 %v598_v31, %v431_v30 }
 0x40a   :  { %1063 = vmatmul.mubr.msk.bf16.vlgmr.msra.gmra.mxu1 %vm177_vm1, %v599_v32 }
 0x40b   :  { %1082 = vmatprep.mubr.msk.bf16.mxu1 %vm1336_vm0, %v1335_v0  ;;  %1075 = vmatpush3.bf16.msra.mxu1 %v1113_v54 }
 0x40c   :  { %1076 = vmatprep.subr.bf16.mxu1 %v1335_v0 }
 0x40f   :  { %1077 = vmatpush3.bf16.msra.mxu1 %v1114_v11 }
 0x410   :  { %1078 = vmatprep.subr.bf16.mxu1 %v1335_v0 }
 0x413   :  { %1079 = vmatpush3.bf16.msra.mxu1 %v1115_v12 }
 0x414   :  { %1080 = vmatprep.subr.bf16.mxu1 %v1335_v0  ;;  %v962_v0 = vld [vmem:[%s1595_s10] ss:$0 sm:$0xff] }
 0x417   :  { %1081 = vmatpush3.bf16.msra.mxu1 %v1116_v13 }
 0x4ca   :  { %v660_v34 = vpop.f32.mrf.mxu1 }
 0x4cb   :  { %v661_v35 = vadd.f32 %v952_v33, %v660_v34 }
 0x4cc   :  { %v1064_v36 = vpop.f32.mrf.mxu1 }
 0x4cd   :  { %v667_v37 = vadd.f32 %v661_v35, %v1467_v3 }
 0x4ce   :  { %v663_v38 = vpop.f32.mrf.mxu1 }
 0x4cf   :  { %v664_v39 = vadd.f32 %v952_v33, %v663_v38  ;;  %v671_v40 = vsel %vm177_vm1, %v667_v37, 0.0 }
 0x4d0   :  { %672 = vadd.xlane.f32.xlu0 %v671_v40  ;;  %v1065_v41 = vpop.f32.mrf.mxu1 }
 0x4d1   :  { %v668_v42 = vadd.f32 %v664_v39, %v1472_v4  ;;  %v1112_v4 = vld [vmem:[#allocation10] sm:$0xff]  }
 0x4d2   :  { %1069 = vmatpush3.bf16.msra.mxu0 %v1112_v4 }
 0x4d3   :  { %v674_v43 = vsel %vm177_vm1, %v668_v42, 0.0 }
 0x4d4   :  { %675 = vadd.xlane.f32.xlu1 %v674_v43 }
 0x559   :  { %v673_v44 = vpop.xlane.xlu0 %672 }
 0x55a   :  { %v678_v45 = vmul.f32 0.03125, %v673_v44 }
 0x55c   :  { %v680_v46 = vsub.f32 %v667_v37, %v678_v45 }
 0x55d   :  { %v676_v47 = vpop.xlane.xlu1 %675 }
 0x55e   :  { %v679_v48 = vmul.f32 0.03125, %v676_v47  ;;  %v682_v49 = vmul.f32 %v680_v46, %v680_v46 }
 0x560   :  { %v681_v50 = vsub.f32 %v668_v42, %v679_v48  ;;  %v684_v3 = vsel %vm177_vm1, %v682_v49, 0.0 }
 0x561   :  { %685 = vadd.xlane.f32.xlu0 %v684_v3  ;;  %v968_v3 = vld [vmem:[%s1596_s11] ss:$0 sm:$0xff] }
 0x562   :  { %v683_v51 = vmul.f32 %v681_v50, %v681_v50 }
 0x564   :  { %v687_v52 = vsel %vm177_vm1, %v683_v51, 0.0 }
 0x565   :  { %688 = vadd.xlane.f32.xlu0 %v687_v52  ;;  %v969_v52 = vld [vmem:[%s1597_s12] ss:$0 sm:$0xff] }
 0x5ea   :  { %v686_v55 = vpop.xlane.xlu0 %685 }
 0x5eb   :  { %v690_v56 = vmul.f32 0.03125, %v686_v55 }
 0x5ed   :  { %v692_v57 = vadd.f32 1e-06, %v690_v56 }
 0x5ee   :  { %v689_v58 = vpop.xlane.xlu0 %688 }
 0x5ef   :  { %1125 = vrsqrt.f32 %v692_v57  ;;  %v691_v59 = vmul.f32 0.03125, %v689_v58 }
 0x5f1   :  { %v693_v60 = vadd.f32 1e-06, %v691_v59 }
 0x5f3   :  { %1127 = vrsqrt.f32 %v693_v60 }
 0x5fc   :  { %v1126_v61 = vpop.eup %1125 }
 0x5fd   :  { %v696_v62 = vmul.f32 %v1126_v61, %v680_v46 }
 0x5ff   :  { %v704_v5 = vmul.f32 %v956_v63, %v696_v62 }
 0x600   :  { %v1128_v1 = vpop.eup %1127 }
 0x601   :  { %v697_v2 = vmul.f32 %v1128_v1, %v681_v50  ;;  %v712_v8 = vadd.f32 %v957_v6, %v704_v5 }
 0x603   :  { %v705_v7 = vmul.f32 %v956_v63, %v697_v2 }
 0x605   :  { %v713_v9 = vadd.f32 %v957_v6, %v705_v7 }
 0x607   :  { %v714_v10 = vpack.c.bf16 %v713_v9, %v712_v8 }
 0x609   :  { %1071 = vmatmul.mubr.msk.bf16.vlgmr.msra.gmra.mxu0 %vm177_vm1, %v714_v10 }
 0x6c9   :  { %v775_v15 = vpop.f32.mrf.mxu0 }
 0x6ca   :  { %v776_v17 = vadd.f32 %v958_v14, %v775_v15 }
 0x6cb   :  { %v1072_v16 = vpop.f32.mrf.mxu0 }
 0x6cc   :  { %v782_v21 = vmax.f32 %v776_v17, 0.0 }
 0x6cd   :  { %v778_v18 = vpop.f32.mrf.mxu0 }
 0x6ce   :  { %v779_v19 = vadd.f32 %v958_v14, %v778_v18 }
 0x6cf   :  { %v1073_v20 = vpop.f32.mrf.mxu0 }
 0x6d0   :  { %v783_v22 = vmax.f32 %v779_v19, 0.0 }
 0x6d2   :  { %v784_v23 = vpack.c.bf16 %v783_v22, %v782_v21 }
 0x6d4   :  { %1083 = vmatmul.mubr.msk.bf16.vlgmr.msra.gmra.mxu1 %vm824_vm3, %v784_v23 }
 0x794   :  { %v862_v24 = vpop.f32.mrf.mxu1 }
 0x795   :  { %v863_v25 = vadd.f32 %v962_v0, %v862_v24 }
 0x796   :  { %v1084_v26 = vpop.f32.mrf.mxu1 }
 0x797   :  { %v869_v27 = vadd.f32 %v863_v25, %v712_v8 }
 0x798   :  { %v865_v28 = vpop.f32.mrf.mxu1 }
 0x799   :  { %v866_v29 = vadd.f32 %v962_v0, %v865_v28  ;;  %v873_v30 = vsel %vm177_vm1, %v869_v27, 0.0 }
 0x79a   :  { %874 = vadd.xlane.f32.xlu1 %v873_v30  ;;  %v1085_v31 = vpop.f32.mrf.mxu1 }
 0x79b   :  { %v870_v32 = vadd.f32 %v866_v29, %v713_v9 }
 0x79d   :  { %v876_v33 = vsel %vm177_vm1, %v870_v32, 0.0 }
 0x79e   :  { %877 = vadd.xlane.f32.xlu0 %v876_v33 }
 0x823   :  { %v875_v34 = vpop.xlane.xlu1 %874 }
 0x824   :  { %v879_v35 = vmul.f32 0.03125, %v875_v34 }
 0x826   :  { %v881_v36 = vsub.f32 %v869_v27, %v879_v35 }
 0x827   :  { %v878_v37 = vpop.xlane.xlu0 %877 }
 0x828   :  { %v880_v38 = vmul.f32 0.03125, %v878_v37  ;;  %v883_v39 = vmul.f32 %v881_v36, %v881_v36 }
 0x82a   :  { %v882_v40 = vsub.f32 %v870_v32, %v880_v38  ;;  %v885_v41 = vsel %vm177_vm1, %v883_v39, 0.0 }
 0x82b   :  { %886 = vadd.xlane.f32.xlu1 %v885_v41 }
 0x82c   :  { %v884_v42 = vmul.f32 %v882_v40, %v882_v40 }
 0x82e   :  { %v888_v43 = vsel %vm177_vm1, %v884_v42, 0.0 }
 0x82f   :  { %889 = vadd.xlane.f32.xlu0 %v888_v43 }
 0x8b4   :  { %v887_v44 = vpop.xlane.xlu1 %886 }
 0x8b5   :  { %v891_v45 = vmul.f32 0.03125, %v887_v44 }
 0x8b7   :  { %v893_v46 = vadd.f32 1e-06, %v891_v45 }
 0x8b8   :  { %v890_v47 = vpop.xlane.xlu0 %889 }
 0x8b9   :  { %1129 = vrsqrt.f32 %v893_v46  ;;  %v892_v48 = vmul.f32 0.03125, %v890_v47 }
 0x8bb   :  { %v894_v49 = vadd.f32 1e-06, %v892_v48 }
 0x8bd   :  { %1131 = vrsqrt.f32 %v894_v49 }
 0x8c6   :  { %v1130_v50 = vpop.eup %1129 }
 0x8c7   :  { %v897_v51 = vmul.f32 %v1130_v50, %v881_v36 }
 0x8c9   :  { %v905_v53 = vmul.f32 %v968_v3, %v897_v51 }
 0x8ca   :  { %v1132_v4 = vpop.eup %1131 }
 0x8cb   :  { %v898_v54 = vmul.f32 %v1132_v4, %v882_v40  ;;  %v913_v55 = vadd.f32 %v969_v52, %v905_v53 }
 0x8cd   :  { %v906_v56 = vmul.f32 %v968_v3, %v898_v54  ;;  %915 = vst.msk [vmem:[#allocation16] sm:$0xff] %vm177_vm1, %v913_v55 }
 0x8cf   :  { %v914_v57 = vadd.f32 %v969_v52, %v906_v56 }
 0x8d1   :  { %916 = vst.msk [vmem:[#allocation16 + $0x8] sm:$0xff] %vm177_vm1, %v914_v57 }
 0x8d2   :  { %1304 = shalt.err (!%p1301_p2)
}
 0x8d3   :  { %s1340_s11 = smov 128   ;;  %s1341_s12 = smov 8  }
 0x8d4   :  { %928 = dma.vmem_to_hbm [thread:$0]  %s923_s14, 256, %s1600_s15, [#allocation4], %s1340_s11, %s1340_s11, %s1341_s12  }
 0x8d5   :  { %1323 = dma.done.wait [#allocation4], 256  }
 0x8d6   :  { %1324 = vsyncadd [#allocation4], 4294967040 }
 0x8d7   :  { %932 = vsyncpa [#allocation3], 1 }
 0x8d8   :  { %933 = vsyncpa [#allocation6], 1 }
 0x8d9   :  { %934 = vsyncpa [#allocation9], 1 }
 0x8da   :  { %935 = vsyncpa [#allocation12], 1 }
 0x8db   :  { %936 = vsyncpa [#allocation15], 1 }
 0x8dc   :  { %937 = vsyncpa [#allocation4], 1 }

</bundles_post_ra>
